<compile_context>
chip_gen: v7x
topology: tpu7x:2x2x1
jax: 0.10.0
libtpu: 0.0.40
codegen_flags: <defaults>
</compile_context>

<pallas_src>
import functools

import jax
import jax.numpy as jnp
from jax.experimental import pallas as pl
from jax.experimental.pallas import tpu as pltpu


def _round_up(a: int, m: int) -> int:
    return ((a + m - 1) // m) * m


def _sentence_maxpool_kernel(x_ref, w_ref, b_ref, o_ref, *, tb: int, s: int):
    # x_ref: (TB*S, D_in)  [or (TB, S, D_in) fallback when S % 8 != 0]
    # w_ref: (D_in, TN)    weight tile (grid-invariant when n_blocks == 1)
    # b_ref: (1, TN)       bias tile
    # o_ref: (TB, TN)      output rows for this (batch, N) tile
    d_in = x_ref.shape[-1]
    if x_ref.ndim == 3:
        # Fallback path (S % 8 != 0): merge costs a VMEM copy but stays correct.
        x2 = x_ref[...].reshape(tb * s, d_in)
    else:
        x2 = x_ref[...]  # collapsed in the wrapper -> no in-kernel copy
    # One big MXU matmul with M = TB*S.
    y = jnp.dot(x2, w_ref[...], preferred_element_type=jnp.float32)  # (TB*S, TN)
    # Max over the sequence axis first (free split since S % 8 == 0 on the
    # fast path), then bias + ReLU.  Exact rewrite of max_s(relu(z_s + b)).
    m = jnp.max(y.reshape(tb, s, y.shape[-1]), axis=1)               # (TB, TN)
    o_ref[...] = jnp.maximum(m + b_ref[...], 0.0).astype(o_ref.dtype)


def sentence_maxpool(x, weight, bias):
    """x: (B, S, D_in) f32; weight: (D_in, D_out); bias: (D_out,) -> (B, D_out)."""
    B, S, D_in = x.shape
    D_out = weight.shape[1]
    itemsize = jnp.dtype(x.dtype).itemsize

    # --- N granularity / padding -------------------------------------------
    # 256 fills the v6e/v7x 256x256 MXU when the layer is wide; 128 avoids
    # padding waste for small D_out (and is native on v5e's 128x128 MXU).
    gran = 256 if D_out > 128 else 128
    Dp0 = _round_up(D_out, gran)

    # --- N tiling of the weight so the resident block fits scoped VMEM ------
    max_w_block_bytes = 8 << 20
    if D_in * Dp0 * itemsize <= max_w_block_bytes:
        TN = Dp0
    else:
        TN = max(gran, ((max_w_block_bytes // (D_in * itemsize)) // gran) * gran)
    Dp = _round_up(Dp0, TN)
    n_blocks = Dp // TN

    # --- TB: batch elements per grid step (byte-budgeted) -------------------
    target_rows = 512                                   # TB*S rows per matmul
    TB = _round_up(max(1, -(-target_rows // S)), 8)     # ceil, multiple of 8
    max_x_block_bytes = 4 << 20                         # per buffer (x2 buffers)
    while TB > 8 and TB * S * D_in * itemsize > max_x_block_bytes:
        TB -= 8
    TB = max(8, min(TB, _round_up(B, 8)))
    b_blocks = pl.cdiv(B, TB)

    # --- Pad weight / bias along D_out only (no batch padding of x) ---------
    wp = weight if Dp == D_out else jnp.pad(weight, ((0, 0), (0, Dp - D_out)))
    bp = bias if Dp == D_out else jnp.pad(bias, (0, Dp - D_out))
    bias2d = bp.reshape(1, Dp)

    # --- x block: collapse (B, S, D_in) -> (B*S, D_in) in the wrapper -------
    if S % 8 == 0:
        x_arg = x.reshape(B * S, D_in)
        x_spec = pl.BlockSpec((TB * S, D_in), lambda b, n: (b, 0))
    else:
        x_arg = x
        x_spec = pl.BlockSpec((TB, S, D_in), lambda b, n: (b, 0, 0))

    # --- Weight / bias specs: single-buffer when grid-invariant -------------
    if n_blocks == 1:
        w_spec = pl.BlockSpec((D_in, TN), lambda b, n: (0, n),
                              pipeline_mode=pl.Buffered(1))
        b_spec = pl.BlockSpec((1, TN), lambda b, n: (0, n),
                              pipeline_mode=pl.Buffered(1))
    else:
        w_spec = pl.BlockSpec((D_in, TN), lambda b, n: (0, n))
        b_spec = pl.BlockSpec((1, TN), lambda b, n: (0, n))

    out_spec = pl.BlockSpec((TB, TN), lambda b, n: (b, n))

    # --- VMEM limit: sized from blocks, capped below physical ---------------
    x_block_bytes = TB * S * D_in * itemsize
    w_block_bytes = D_in * TN * itemsize
    y_bytes = TB * S * TN * 4
    o_block_bytes = TB * TN * itemsize
    need = (2 * x_block_bytes
            + (1 if n_blocks == 1 else 2) * w_block_bytes
            + 2 * o_block_bytes + y_bytes + (1 << 20))
    try:
        vmem_cap = int(pltpu.get_tpu_info().vmem_capacity_bytes)
    except Exception:
        vmem_cap = 64 << 20  # conservative (v7x physical per-TC)
    vmem_limit = min(max(2 * need, 32 << 20), (vmem_cap * 7) // 8)

    # --- Cost estimate (advisory) -------------------------------------------
    w_fetches = 1 if n_blocks == 1 else b_blocks
    cost = pl.CostEstimate(
        flops=2 * B * S * D_in * Dp,
        transcendentals=0,
        bytes_accessed=(B * S * D_in + w_fetches * D_in * Dp + Dp + B * Dp)
        * itemsize,
    )

    kernel = functools.partial(_sentence_maxpool_kernel, tb=TB, s=S)

    out = pl.pallas_call(
        kernel,
        out_shape=jax.ShapeDtypeStruct((B, Dp), x.dtype),
        grid_spec=pltpu.PrefetchScalarGridSpec(
            num_scalar_prefetch=0,
            grid=(b_blocks, n_blocks),
            in_specs=[x_spec, w_spec, b_spec],
            out_specs=out_spec,
        ),
        compiler_params=pltpu.CompilerParams(
            dimension_semantics=("parallel", "parallel"),
            vmem_limit_bytes=int(vmem_limit),
        ),
        cost_estimate=cost,
    )(x_arg, wp, bias2d)

    return out[:, :D_out]


def reference(x, weight, bias):
    y = jnp.einsum("bsd,do->bso", x, weight) + bias
    y = jnp.maximum(y, 0.0)
    return jnp.max(y, axis=1)


if __name__ == "__main__":
    # Small shapes consistent with the module: batch=2, seq=8, word_dim=32, out=32
    B, S, D_in, D_out = 2, 8, 32, 32

    key = jax.random.PRNGKey(0)
    kx, kw, kb = jax.random.split(key, 3)

    x = jax.random.normal(kx, (B, S, D_in), dtype=jnp.float32)
    # Deterministic synthetic Linear params (PyTorch would use Kaiming uniform).
    bound = 1.0 / (D_in ** 0.5)
    weight = jax.random.uniform(kw, (D_in, D_out), jnp.float32, -bound, bound)
    bias = jax.random.uniform(kb, (D_out,), jnp.float32, -bound, bound)

    out = sentence_maxpool(x, weight, bias)
    out = jax.block_until_ready(out)

    ref = reference(x, weight, bias)
    assert out.shape == (B, D_out), out.shape
    assert jnp.allclose(out, ref, atol=1e-5, rtol=1e-5), "mismatch vs reference"

    print("KERNEL_OK")
</pallas_src>

<mosaic_0001>
module attributes {stable_mosaic.version = 11 : i64} {
  func.func @_sentence_maxpool_kernel(%arg0: i32, %arg1: i32, %arg2: memref<64x32xf32, #tpu.memory_space<vmem>>, %arg3: memref<32x128xf32, #tpu.memory_space<vmem>>, %arg4: memref<1x128xf32, #tpu.memory_space<vmem>>, %arg5: memref<8x128xf32, #tpu.memory_space<vmem>>) attributes {dimension_semantics = [#tpu.dimension_semantics<parallel>, #tpu.dimension_semantics<parallel>], iteration_bounds = array<i64: 1, 1>, scalar_prefetch = 0 : i64, scratch_operands = 0 : i64, tpu.core_type = #tpu.core_type<tc>, window_params = [{transform_indices = @transform_0, window_bounds = array<i64: 64, 32>}, {pipeline_mode = #tpu.pipeline_mode<synchronous>, transform_indices = @transform_1, window_bounds = array<i64: 32, 128>}, {pipeline_mode = #tpu.pipeline_mode<synchronous>, transform_indices = @transform_2, window_bounds = array<i64: 1, 128>}, {transform_indices = @transform_3, window_bounds = array<i64: 8, 128>}]} {
    %c0 = arith.constant 0 : index
    %c0_0 = arith.constant 0 : index
    %0 = vector.load %arg2[%c0, %c0_0] : memref<64x32xf32, #tpu.memory_space<vmem>>, vector<64x32xf32>
    %c0_1 = arith.constant 0 : index
    %c0_2 = arith.constant 0 : index
    %1 = vector.load %arg3[%c0_1, %c0_2] : memref<32x128xf32, #tpu.memory_space<vmem>>, vector<32x128xf32>
    %cst = arith.constant dense<0.000000e+00> : vector<64x128xf32>
    %2 = tpu.matmul %0, %1, %cst {dimension_numbers = #tpu.dot_dimension_numbers<[1], [0], [0], [1], [0, 0, 1, 1], [], []>} : vector<64x32xf32>, vector<32x128xf32>, vector<64x128xf32> -> vector<64x128xf32>
    %3 = vector.shape_cast %2 : vector<64x128xf32> to vector<8x8x128xf32>
    %cst_3 = arith.constant dense<0xFF800000> : vector<8x128xf32>
    %4 = vector.multi_reduction <maximumf>, %3, %cst_3 [1] : vector<8x8x128xf32> to vector<8x128xf32>
    %c0_4 = arith.constant 0 : index
    %c0_5 = arith.constant 0 : index
    %5 = vector.load %arg4[%c0_4, %c0_5] : memref<1x128xf32, #tpu.memory_space<vmem>>, vector<1x128xf32>
    %6 = vector.broadcast %5 : vector<1x128xf32> to vector<8x128xf32>
    %7 = arith.addf %4, %6 : vector<8x128xf32>
    %cst_6 = arith.constant 0.000000e+00 : f32
    %8 = vector.broadcast %cst_6 : f32 to vector<8x128xf32>
    %9 = arith.maximumf %7, %8 : vector<8x128xf32>
    %c0_7 = arith.constant 0 : index
    %c0_8 = arith.constant 0 : index
    %10 = vector.load %arg5[%c0_7, %c0_8] : memref<8x128xf32, #tpu.memory_space<vmem>>, vector<8x128xf32>
    tpu.vector_store %arg5[%c0_7, %c0_8], %9 {strides = array<i32>} : memref<8x128xf32, #tpu.memory_space<vmem>>, vector<8x128xf32>,
    return
  }
  func.func @transform_0(%arg0: i32, %arg1: i32) -> (i32, i32) {
    %c0_i32 = arith.constant 0 : i32
    %c0_i32_0 = arith.constant 0 : i32
    return %arg0, %c0_i32 : i32, i32
  }
  func.func @transform_1(%arg0: i32, %arg1: i32) -> (i32, i32) {
    %c0_i32 = arith.constant 0 : i32
    %c0_i32_0 = arith.constant 0 : i32
    return %c0_i32, %arg1 : i32, i32
  }
  func.func @transform_2(%arg0: i32, %arg1: i32) -> (i32, i32) {
    %c0_i32 = arith.constant 0 : i32
    %c0_i32_0 = arith.constant 0 : i32
    return %c0_i32, %arg1 : i32, i32
  }
  func.func @transform_3(%arg0: i32, %arg1: i32) -> (i32, i32) {
    %c0_i32 = arith.constant 0 : i32
    return %arg0, %arg1 : i32, i32
  }
}

</mosaic_0001>

<bundles_post_ra>
// kernel: tpu_custom_call.1
= control target key start
LH: loop header
LB: loop body
LE: loop exit
PB: predicated region body
PF: predicated region fallthrough
CT: control target
= control target key end

     0   :  { %8 = vsyncpa [#allocation3], 0  ;;  %s511_s0 = inlined_call_operand.hbm [shape: f32[16,32], index: 0, kind: input, shape index: {}]   ;;  %s512_s1 = inlined_call_operand.hbm [shape: f32[32,128], index: 1, kind: input, shape index: {}]   ;;  %s513_s2 = inlined_call_operand.vmem [shape: f32[1,128], index: 2, kind: input, shape index: {}]   ;;  %s514_s3 = inlined_call_operand.hbm [shape: f32[2,128], index: 3, kind: output, shape index: {}]  }
   0x1   :  { %9 = vsyncpa [#allocation6], 0 }
   0x2   :  { %10 = vsyncpa [#allocation4], 0 }
   0x3   :  { %15 = vsyncadd [#allocation3], 768  ;;  %s437_s12 = smov [#allocation2]   ;;  %s365_s16 = scalar_lea.hbm %s511_s0, 256 }
   0x4   :  { %s16_s13 = sshll.u32 %s437_s12, 4  ;;  %p366_p0 = scmp.ne.s32.totalorder %s511_s0, %s365_s16  ;;  %s17_s13 = int_to_ptr.vmem [resolvable:$true] %s16_s13 }
   0x5   :  { %p369_p1 = scmp.lt.u32.totalorder %s365_s16, %s511_s0 }
   0x7   :  { %p371_p2 = pnand %p369_p1, %p366_p0 }
   0x9   :  { %374 = shalt.err (!%p371_p2)
}
   0xa   :  { %s375_s21 = scalar_lea.vmem %s17_s13, 256  ;;  %s379_s22 = scalar_lea.vmem %s17_s13, 1024 }
   0xb   :  { %p376_p3 = scmp.ne.s32.totalorder %s17_s13, %s375_s21  ;;  %p380_p4 = scmp.lt.s32.totalorder %s17_s13, %s17_s13 }
   0xc   :  { %p381_p5 = scmp.lt.s32.totalorder %s379_s22, %s375_s21 }
   0xe   :  { %p382_p6 = por %p381_p5, %p380_p4 }
  0x10   :  { %p383_p7 = pnand %p382_p6, %p376_p3 }
  0x12   :  { %386 = shalt.err (!%p383_p7)
}
  0x13   :  { %s438_s23 = smov 128   ;;  %s439_s24 = smov 8  }
  0x14   :  { %22 = dma.hbm_to_vmem [thread:$0]  %s511_s0, 256, %s17_s13, [#allocation3], %s438_s23, %s438_s23, %s439_s24  }
  0x15   :  { %s440_s27 = smov [#allocation5]   ;;  %s387_s4 = scalar_lea.hbm %s512_s1, 512 }
  0x16   :  { %s28_s28 = sshll.u32 %s440_s27, 4  ;;  %p388_p8 = scmp.ne.s32.totalorder %s512_s1, %s387_s4  ;;  %s29_s28 = int_to_ptr.vmem [resolvable:$true] %s28_s28 }
  0x17   :  { %p391_p9 = scmp.lt.u32.totalorder %s387_s4, %s512_s1 }
  0x19   :  { %p393_p10 = pnand %p391_p9, %p388_p8 }
  0x1b   :  { %396 = shalt.err (!%p393_p10)
}
  0x1c   :  { %s397_s9 = scalar_lea.vmem %s29_s28, 512  ;;  %p402_p12 = scmp.lt.s32.totalorder %s29_s28, %s29_s28 }
  0x1d   :  { %p398_p11 = scmp.ne.s32.totalorder %s29_s28, %s397_s9  ;;  %p403_p13 = scmp.lt.s32.totalorder %s397_s9, %s397_s9 }
  0x1f   :  { %p404_p0 = por %p403_p13, %p402_p12 }
  0x21   :  { %p405_p1 = pnand %p404_p0, %p398_p11 }
  0x23   :  { %408 = shalt.err (!%p405_p1)
}
  0x24   :  { %34 = dma.hbm_to_vmem [thread:$0]  %s512_s1, 512, %s29_s28, [#allocation6], %s438_s23, %s438_s23, %s439_s24  }
  0x25   :  { %431 = dma.done.wait [#allocation3], 1024  }
  0x26   :  { %432 = vsyncadd [#allocation3], 4294966272 }
  0x27   :  { %433 = dma.done.wait [#allocation6], 512  }
  0x28   :  { %434 = vsyncadd [#allocation6], 4294966784  ;;  %vm55_vm0 = vcmask 261120   ;;  %v51_v0 = vld [vmem:[#allocation5] sm:$0xff]  ;;  %v52_v1 = vld [vmem:[#allocation5 + $0x8] sm:$0xff]  ;;  %vm265_vm1 = vcmask 1041409  }
  0x29   :  { %v53_v2 = vld [vmem:[#allocation5 + $0x10] sm:$0xff]  ;;  %v346_v3 = vpack.c.bf16 %v52_v1, %v51_v0  ;;  %v54_v4 = vld [vmem:[#allocation5 + $0x18] sm:$0xff]  ;;  %v43_v5 = vld [vmem:[#allocation2] sm:$0xff]  ;;  %vm268_vm2 = vcmask 1042434   ;;  %vm271_vm3 = vcmask 1043459   ;;  %vm274_vm4 = vcmask 1044484  }
  0x2a   :  { %v47_v6 = vld [vmem:[#allocation2 + $0x20] sm:$0xff]  ;;  %v350_v7 = vpack.c.bf16 %v54_v4, %v53_v2  ;;  %334 = vmatprep.mubr.msk.f32.mxu0 %vm55_vm0, %v43_v5  ;;  %v44_v8 = vld [vmem:[#allocation2 + $0x8] sm:$0xff]  ;;  %v45_v10 = vld [vmem:[#allocation2 + $0x10] sm:$0xff]  ;;  %vm277_vm5 = vcmask 1045509   ;;  %vm280_vm6 = vcmask 1046534   ;;  %vm283_vm7 = vcmask 1047559  }
  0x2b   :  { %340 = vmatprep.mubr.msk.f32.mxu1 %vm55_vm0, %v47_v6  ;;  %347 = vmatprep.subr.bf16.mxu0 %v346_v3  ;;  %v48_v9 = vld [vmem:[#allocation2 + $0x28] sm:$0xff]  ;;  %v49_v11 = vld [vmem:[#allocation2 + $0x30] sm:$0xff]  ;;  %v46_v12 = vld [vmem:[#allocation2 + $0x18] sm:$0xff] }
  0x2c   :  { %354 = vmatprep.subr.bf16.mxu1 %v346_v3  ;;  %349 = vmatpush3.bf16.msra.mxu0 %v346_v3  ;;  %v50_v13 = vld [vmem:[#allocation2 + $0x38] sm:$0xff]  ;;  %v313_v50 = vld [vmem:[%s513_s2] ss:$0 sm:$0xff] }
  0x2d   :  { %356 = vmatpush3.bf16.msra.mxu1 %v346_v3  ;;  %351 = vmatprep.subr.bf16.mxu0 %v350_v7 }
  0x2e   :  { %355 = vmatprep.subr.bf16.mxu1 %v350_v7 }
  0x30   :  { %353 = vmatpush3.bf16.msra.mxu0 %v350_v7 }
  0x31   :  { %357 = vmatpush3.bf16.msra.mxu1 %v350_v7 }
  0x33   :  { %335 = vmatmul.mubr.msk.f32.vlgmr.msra.gmra.mrb[0].mxu0 %vm55_vm0, %v44_v8 }
  0x34   :  { %341 = vmatmul.mubr.msk.f32.vlgmr.msra.gmra.mrb[0].mxu1 %vm55_vm0, %v48_v9  ;;  %337 = vmatprep.mubr.msk.f32.mxu0 %vm55_vm0, %v45_v10 }
  0x35   :  { %343 = vmatprep.mubr.msk.f32.mxu1 %vm55_vm0, %v49_v11 }
  0x37   :  { %338 = vmatmul.mubr.msk.f32.gmra.mrb[2].mxu0 %vm55_vm0, %v46_v12 }
  0x38   :  { %344 = vmatmul.mubr.msk.f32.gmra.mrb[2].mxu1 %vm55_vm0, %v50_v13 }
 0x106   :  { %v336_v14 = vpop.f32.mrb[0].mxu0 }
 0x107   :  { %v342_v15 = vpop.f32.mrb[0].mxu1  ;;  %v191_v16 = vrot.slane %v336_v14, 4  ;;  %v146_v18 = vpop.f32.mrb[1].mxu0 }
 0x108   :  { %v215_v17 = vrot.slane %v342_v15, 4  ;;  %v166_v19 = vpop.f32.mrb[1].mxu1  ;;  %v185_v20 = vrot.slane %v146_v18, 4 }
 0x109   :  { %v209_v21 = vrot.slane %v166_v19, 4  ;;  %v192_v22 = vmax.f32 %v336_v14, %v191_v16 }
 0x10a   :  { %v216_v23 = vmax.f32 %v342_v15, %v215_v17  ;;  %v186_v24 = vmax.f32 %v146_v18, %v185_v20  ;;  %v339_v26 = vpop.f32.mrb[2].mxu0 }
 0x10b   :  { %v210_v25 = vmax.f32 %v166_v19, %v209_v21  ;;  %v345_v27 = vpop.f32.mrb[2].mxu1  ;;  %v193_v28 = vrot.slane %v192_v22, 2  ;;  %v203_v30 = vrot.slane %v339_v26, 4  ;;  %v156_v32 = vpop.f32.mrb[3].mxu0 }
 0x10c   :  { %v217_v29 = vrot.slane %v216_v23, 2  ;;  %v227_v31 = vrot.slane %v345_v27, 4  ;;  %v176_v33 = vpop.f32.mrb[3].mxu1  ;;  %v187_v34 = vrot.slane %v186_v24, 2  ;;  %v197_v36 = vrot.slane %v156_v32, 4 }
 0x10d   :  { %v211_v35 = vrot.slane %v210_v25, 2  ;;  %v221_v37 = vrot.slane %v176_v33, 4  ;;  %v194_v38 = vmax.f32 %v192_v22, %v193_v28  ;;  %v204_v40 = vmax.f32 %v339_v26, %v203_v30 }
 0x10e   :  { %v218_v39 = vmax.f32 %v216_v23, %v217_v29  ;;  %v228_v41 = vmax.f32 %v345_v27, %v227_v31  ;;  %v188_v42 = vmax.f32 %v186_v24, %v187_v34  ;;  %v198_v44 = vmax.f32 %v156_v32, %v197_v36 }
 0x10f   :  { %v212_v43 = vmax.f32 %v210_v25, %v211_v35  ;;  %v222_v45 = vmax.f32 %v176_v33, %v221_v37  ;;  %v195_v46 = vrot.slane %v194_v38, 1  ;;  %v205_v48 = vrot.slane %v204_v40, 2 }
 0x110   :  { %v219_v47 = vrot.slane %v218_v39, 1  ;;  %v229_v49 = vrot.slane %v228_v41, 2  ;;  %v189_v51 = vrot.slane %v188_v42, 1  ;;  %v199_v53 = vrot.slane %v198_v44, 2 }
 0x111   :  { %v213_v52 = vrot.slane %v212_v43, 1  ;;  %v223_v54 = vrot.slane %v222_v45, 2  ;;  %v196_v55 = vmax.f32 %v194_v38, %v195_v46  ;;  %v206_v56 = vmax.f32 %v204_v40, %v205_v48 }
 0x112   :  { %v230_v57 = vmax.f32 %v228_v41, %v229_v49  ;;  %v190_v58 = vmax.f32 %v188_v42, %v189_v51  ;;  %v200_v60 = vmax.f32 %v198_v44, %v199_v53  ;;  %v220_v63 = vmax.f32 %v218_v39, %v219_v47 }
 0x113   :  { %v214_v59 = vmax.f32 %v212_v43, %v213_v52  ;;  %v224_v61 = vmax.f32 %v222_v45, %v223_v54  ;;  %v241_v62 = vadd.f32 %v313_v50, %v196_v55  ;;  %v207_v0 = vrot.slane %v206_v56, 1 }
 0x114   :  { %v231_v1 = vrot.slane %v230_v57, 1  ;;  %v240_v2 = vadd.f32 %v313_v50, %v190_v58  ;;  %v201_v3 = vrot.slane %v200_v60, 1  ;;  %v245_v13 = vadd.f32 %v313_v50, %v220_v63 }
 0x115   :  { %v225_v4 = vrot.slane %v224_v61, 1  ;;  %v249_v5 = vmax.f32 %v241_v62, 0.0  ;;  %v208_v6 = vmax.f32 %v206_v56, %v207_v0  ;;  %v244_v9 = vadd.f32 %v313_v50, %v214_v59 }
 0x116   :  { %v232_v7 = vmax.f32 %v230_v57, %v231_v1  ;;  %v248_v8 = vmax.f32 %v240_v2, 0.0  ;;  %v202_v10 = vmax.f32 %v200_v60, %v201_v3  ;;  %v253_v22 = vmax.f32 %v245_v13, 0.0 }
 0x117   :  { %v226_v11 = vmax.f32 %v224_v61, %v225_v4  ;;  %v264_v12 = vrot.slane %v249_v5, 7  ;;  %v243_v14 = vadd.f32 %v313_v50, %v208_v6  ;;  %v252_v20 = vmax.f32 %v244_v9, 0.0 }
 0x118   :  { %v242_v15 = vadd.f32 %v313_v50, %v202_v10  ;;  %v247_v19 = vadd.f32 %v313_v50, %v232_v7  ;;  %v276_v29 = vrot.slane %v253_v22, 3 }
 0x119   :  { %v246_v16 = vadd.f32 %v313_v50, %v226_v11  ;;  %v266_v17 = vsel %vm265_vm1, %v264_v12, %v248_v8  ;;  %v251_v18 = vmax.f32 %v243_v14, 0.0  ;;  %v273_v27 = vrot.slane %v252_v20, 4 }
 0x11a   :  { %v250_v21 = vmax.f32 %v242_v15, 0.0  ;;  %v255_v26 = vmax.f32 %v247_v19, 0.0 }
 0x11b   :  { %v254_v24 = vmax.f32 %v246_v16, 0.0  ;;  %v270_v25 = vrot.slane %v251_v18, 5 }
 0x11c   :  { %v267_v23 = vrot.slane %v250_v21, 6  ;;  %v282_v33 = vrot.slane %v255_v26, 1 }
 0x11d   :  { %v279_v32 = vrot.slane %v254_v24, 2 }
 0x11e   :  { %v269_v28 = vsel %vm268_vm2, %v267_v23, %v266_v17 }
 0x11f   :  { %v272_v30 = vsel %vm271_vm3, %v270_v25, %v269_v28 }
 0x120   :  { %v275_v31 = vsel %vm274_vm4, %v273_v27, %v272_v30 }
 0x121   :  { %v278_v34 = vsel %vm277_vm5, %v276_v29, %v275_v31 }
 0x122   :  { %v281_v35 = vsel %vm280_vm6, %v279_v32, %v278_v34 }
 0x123   :  { %v284_v36 = vsel %vm283_vm7, %v282_v33, %v281_v35 }
 0x124   :  { %286 = vst [vmem:[#allocation7] sm:$0xff] %v284_v36 }
 0x125   :  { %291 = vsyncadd [#allocation4], 96  ;;  %s441_s2 = smov [#allocation7]  }
 0x126   :  { %s292_s12 = sshll.u32 %s441_s2, 4  ;;  %s293_s12 = int_to_ptr.vmem [resolvable:$true] %s292_s12 }
 0x127   :  { %s409_s13 = scalar_lea.vmem %s293_s12, 32  ;;  %s413_s14 = scalar_lea.vmem %s293_s12, 128 }
 0x128   :  { %p410_p2 = scmp.ne.s32.totalorder %s293_s12, %s409_s13  ;;  %p414_p3 = scmp.lt.s32.totalorder %s293_s12, %s293_s12 }
 0x129   :  { %p415_p4 = scmp.lt.s32.totalorder %s413_s14, %s409_s13 }
 0x12b   :  { %p416_p5 = por %p415_p4, %p414_p3 }
 0x12d   :  { %p417_p6 = pnand %p416_p5, %p410_p2 }
 0x12f   :  { %420 = shalt.err (!%p417_p6)
}
 0x130   :  { %s421_s17 = scalar_lea.hbm %s514_s3, 32 }
 0x131   :  { %p422_p7 = scmp.ne.s32.totalorder %s514_s3, %s421_s17  ;;  %p425_p8 = scmp.lt.u32.totalorder %s421_s17, %s514_s3 }
 0x133   :  { %p427_p9 = pnand %p425_p8, %p422_p7 }
 0x135   :  { %430 = shalt.err (!%p427_p9)
}
 0x136   :  { %s442_s22 = smov 32   ;;  %s443_s23 = smov 2  }
 0x137   :  { %298 = dma.vmem_to_hbm [thread:$0]  %s293_s12, 32, %s514_s3, [#allocation4], %s442_s22, %s442_s22, %s443_s23  }
 0x138   :  { %435 = dma.done.wait [#allocation4], 128  }
 0x139   :  { %436 = vsyncadd [#allocation4], 4294967168 }
 0x13a   :  { %302 = vsyncpa [#allocation3], 1 }
 0x13b   :  { %303 = vsyncpa [#allocation6], 1 }
 0x13c   :  { %304 = vsyncpa [#allocation4], 1 }

</bundles_post_ra>
